<compile_context>
chip_gen: v6e
topology: v6e:2x2x1
jax: 0.10.0
libtpu: 0.0.40
codegen_flags: <defaults>
</compile_context>

<pallas_src>
import functools
import math

import jax
import jax.numpy as jnp
from jax.experimental import pallas as pl
from jax.experimental.pallas import tpu as pltpu


# ----------------------------- kernels --------------------------------------

def _posenc_kernel(x_ref, pe_ref, o_ref):
    """Eval mode: out = x + pe (broadcast over batch)."""
    o_ref[...] = (x_ref[...] + pe_ref[...][None, :, :]).astype(o_ref.dtype)


def _posenc_dropout_kernel(x_ref, pe_ref, bits_ref, o_ref, *, threshold, scale):
    """Training mode: out = dropout(x + pe, p) with inverted scaling.

    bits_ref holds uniform uint32 random bits; an element is dropped iff
    bits < threshold (threshold = p * 2^32), so P(drop) == p.
    """
    val = x_ref[...].astype(jnp.float32) + pe_ref[...].astype(jnp.float32)[None, :, :]
    keep = bits_ref[...] >= jnp.uint32(threshold)
    val = jnp.where(keep, val * jnp.float32(scale), jnp.float32(0.0))
    o_ref[...] = val.astype(o_ref.dtype)


# ----------------------------- wrapper ---------------------------------------

def make_positional_encoding(d_model: int, dropout: float = 0.1,
                             max_len: int = 1000):
    """Builds the sinusoidal pe buffer (plain JAX) and returns a callable."""
    position = jnp.arange(0, max_len, dtype=jnp.float32)[:, None]            # (L, 1)
    div_term = jnp.exp(jnp.arange(0, d_model, 2, dtype=jnp.float32)
                       * (-(math.log(10000.0) / d_model)))                   # (D/2,)
    pe = jnp.zeros((max_len, d_model), dtype=jnp.float32)
    pe = pe.at[:, 0::2].set(jnp.sin(position * div_term))
    pe = pe.at[:, 1::2].set(jnp.cos(position * div_term))

    def forward(x, *, training: bool = False, rng=None):
        # x: (batch, seq_len, d_model)
        B, S, D = x.shape
        assert D == d_model and S <= max_len
        pe_slice = pe[:S, :].astype(x.dtype)                                  # (S, D)

        # ---- lane-dense view: last dim presented to the kernel is 128 ------
        if (S * D) % 128 == 0:
            lanes = 128
            R = (S * D) // 128
            x_k = x.reshape(B, R, lanes)
            pe_k = pe_slice.reshape(R, lanes)
        else:
            # TODO(synk): pad S*D up to a multiple of 128 instead of falling
            # back to a (possibly masked-store) D-wide layout.
            R, lanes = S, D
            x_k = x
            pe_k = pe_slice

        # ---- batch tile sized to ~2 MiB per input block (fits v7x VMEM) ----
        row_bytes = R * lanes * x_k.dtype.itemsize
        bt_cap = max(1, (2 << 20) // max(row_bytes, 1))
        Bt = 1
        for d in range(1, B + 1):           # largest divisor of B <= bt_cap
            if B % d == 0 and d <= bt_cap:
                Bt = d
        grid = (B // Bt,)

        blk = (Bt, R, lanes)
        x_spec = pl.BlockSpec(blk, lambda b: (b, 0, 0))
        bits_spec = pl.BlockSpec(blk, lambda b: (b, 0, 0))
        pe_spec = pl.BlockSpec((R, lanes), lambda b: (0, 0))   # resident in VMEM
        out_spec = pl.BlockSpec(blk, lambda b: (b, 0, 0))

        params = pltpu.CompilerParams(dimension_semantics=("parallel",))

        if training and dropout > 0.0:
            if rng is None:
                rng = jax.random.PRNGKey(0)
            bits = jax.random.bits(rng, x_k.shape, dtype=jnp.uint32)
            threshold = min(int(round(dropout * (1 << 32))), (1 << 32) - 1)
            scale = 1.0 / (1.0 - dropout)
            kernel = functools.partial(_posenc_dropout_kernel,
                                       threshold=threshold, scale=scale)
            out = pl.pallas_call(
                kernel,
                out_shape=jax.ShapeDtypeStruct(x_k.shape, x.dtype),
                grid=grid,
                in_specs=[x_spec, pe_spec, bits_spec],
                out_specs=out_spec,
                compiler_params=params,
            )(x_k, pe_k, bits)
        else:
            out = pl.pallas_call(
                _posenc_kernel,
                out_shape=jax.ShapeDtypeStruct(x_k.shape, x.dtype),
                grid=grid,
                in_specs=[x_spec, pe_spec],
                out_specs=out_spec,
                compiler_params=params,
            )(x_k, pe_k)

        return out.reshape(B, S, D)

    return forward, pe


# ------------------------------ test -----------------------------------------

if __name__ == "__main__":
    # small shapes consistent with the module: (batch, seq_len, d_model)
    B, S, D = 2, 8, 32
    p = 0.1
    key = jax.random.PRNGKey(0)
    kx, kd = jax.random.split(key)
    x = jax.random.normal(kx, (B, S, D), dtype=jnp.float32)

    forward, pe = make_positional_encoding(d_model=D, dropout=p, max_len=1000)
    ref = x + pe[None, :S, :]

    # --- eval mode (dropout is identity): exact, deterministic check --------
    out = jax.block_until_ready(forward(x, training=False))
    assert out.shape == (B, S, D)
    assert jnp.allclose(out, ref, atol=1e-6, rtol=1e-6), "mismatch vs reference"

    # --- training mode: reconstruct the exact keep mask the wrapper used ----
    out_tr = jax.block_until_ready(forward(x, training=True, rng=kd))
    assert out_tr.shape == (B, S, D)
    R = (S * D) // 128
    bits = jax.random.bits(kd, (B, R, 128), dtype=jnp.uint32)
    threshold = min(int(round(p * (1 << 32))), (1 << 32) - 1)
    keep = (bits >= jnp.uint32(threshold)).reshape(B, S, D)
    expected = jnp.where(keep, ref / (1.0 - p), 0.0)
    assert jnp.allclose(out_tr, expected, atol=1e-5, rtol=1e-5), "dropout mismatch"

    print("KERNEL_OK")
</pallas_src>

<mosaic_0001>
module attributes {stable_mosaic.version = 11 : i64} {
  func.func @_posenc_kernel(%arg0: i32, %arg1: memref<2x2x128xf32, #tpu.memory_space<vmem>>, %arg2: memref<2x128xf32, #tpu.memory_space<vmem>>, %arg3: memref<2x2x128xf32, #tpu.memory_space<vmem>>) attributes {dimension_semantics = [#tpu.dimension_semantics<parallel>], iteration_bounds = array<i64: 1>, scalar_prefetch = 0 : i64, scratch_operands = 0 : i64, tpu.core_type = #tpu.core_type<tc>, window_params = [{transform_indices = @transform_0, window_bounds = array<i64: 2, 2, 128>}, {pipeline_mode = #tpu.pipeline_mode<synchronous>, transform_indices = @transform_1, window_bounds = array<i64: 2, 128>}, {transform_indices = @transform_2, window_bounds = array<i64: 2, 2, 128>}]} {
    %c0 = arith.constant 0 : index
    %c0_0 = arith.constant 0 : index
    %c0_1 = arith.constant 0 : index
    %0 = vector.load %arg1[%c0, %c0_0, %c0_1] : memref<2x2x128xf32, #tpu.memory_space<vmem>>, vector<2x2x128xf32>
    %c0_2 = arith.constant 0 : index
    %c0_3 = arith.constant 0 : index
    %1 = vector.load %arg2[%c0_2, %c0_3] : memref<2x128xf32, #tpu.memory_space<vmem>>, vector<2x128xf32>
    %2 = vector.shape_cast %1 : vector<2x128xf32> to vector<1x2x128xf32>
    %3 = vector.broadcast %2 : vector<1x2x128xf32> to vector<2x2x128xf32>
    %4 = arith.addf %0, %3 : vector<2x2x128xf32>
    %c0_4 = arith.constant 0 : index
    %c0_5 = arith.constant 0 : index
    %c0_6 = arith.constant 0 : index
    %5 = vector.load %arg3[%c0_4, %c0_5, %c0_6] : memref<2x2x128xf32, #tpu.memory_space<vmem>>, vector<2x2x128xf32>
    tpu.vector_store %arg3[%c0_4, %c0_5, %c0_6], %4 {strides = array<i32>} : memref<2x2x128xf32, #tpu.memory_space<vmem>>, vector<2x2x128xf32>,
    return
  }
  func.func @transform_0(%arg0: i32) -> (i32, i32, i32) {
    %c0_i32 = arith.constant 0 : i32
    %c0_i32_0 = arith.constant 0 : i32
    %c0_i32_1 = arith.constant 0 : i32
    return %arg0, %c0_i32, %c0_i32_0 : i32, i32, i32
  }
  func.func @transform_1(%arg0: i32) -> (i32, i32) {
    %c0_i32 = arith.constant 0 : i32
    %c0_i32_0 = arith.constant 0 : i32
    %c0_i32_1 = arith.constant 0 : i32
    return %c0_i32, %c0_i32_0 : i32, i32
  }
  func.func @transform_2(%arg0: i32) -> (i32, i32, i32) {
    %c0_i32 = arith.constant 0 : i32
    %c0_i32_0 = arith.constant 0 : i32
    %c0_i32_1 = arith.constant 0 : i32
    return %arg0, %c0_i32, %c0_i32_0 : i32, i32, i32
  }
}

</mosaic_0001>

<bundles_post_ra>
// kernel: tpu_custom_call.1
= control target key start
LH: loop header
LB: loop body
LE: loop exit
PB: predicated region body
PF: predicated region fallthrough
CT: control target
= control target key end

     0   :  { %7 = vsyncpa [#allocation3], 0  ;;  %s169_s0 = inlined_call_operand.hbm [shape: f32[2,2,128], index: 0, kind: input, shape index: {}]   ;;  %s170_s1 = inlined_call_operand.hbm [shape: f32[2,128], index: 1, kind: input, shape index: {}]   ;;  %s171_s2 = inlined_call_operand.hbm [shape: f32[2,2,128], index: 2, kind: output, shape index: {}]  }
   0x1   :  { %8 = vsyncpa [#allocation6], 0 }
   0x2   :  { %9 = vsyncpa [#allocation4], 0  ;;  %s134_s9 = smov [#allocation2]  }
   0x3   :  { %s15_s10 = sshll.u32 %s134_s9, 4  ;;  %s16_s10 = int_to_ptr.vmem [resolvable:$true] %s15_s10 }
   0x4   :  { %s76_s11 = scalar_lea.vmem %s16_s10, 64  ;;  %p81_p1 = scmp.lt.s32.totalorder %s16_s10, %s16_s10 }
   0x5   :  { %p77_p0 = scmp.ne.s32.totalorder %s16_s10, %s76_s11  ;;  %p82_p2 = scmp.lt.s32.totalorder %s76_s11, %s76_s11 }
   0x7   :  { %p83_p3 = por %p82_p2, %p81_p1 }
   0x9   :  { %p84_p4 = pnand %p83_p3, %p77_p0 }
   0xb   :  { %87 = shalt.err (!%p84_p4)
}
   0xc   :  { %s135_s12 = smov 32   ;;  %s136_s13 = smov 2  }
   0xd   :  { %21 = dma.hbm_to_vmem [thread:$0]  %s169_s0, 64, %s16_s10, [#allocation3], %s135_s12, %s135_s12, %s136_s13  }
   0xe   :  { %s137_s16 = smov [#allocation5]  }
   0xf   :  { %s28_s17 = sshll.u32 %s137_s16, 4  ;;  %s29_s17 = int_to_ptr.vmem [resolvable:$true] %s28_s17 }
  0x10   :  { %s96_s18 = scalar_lea.vmem %s29_s17, 32  ;;  %p101_p6 = scmp.lt.s32.totalorder %s29_s17, %s29_s17 }
  0x11   :  { %p97_p5 = scmp.ne.s32.totalorder %s29_s17, %s96_s18  ;;  %p102_p7 = scmp.lt.s32.totalorder %s96_s18, %s96_s18 }
  0x13   :  { %p103_p8 = por %p102_p7, %p101_p6 }
  0x15   :  { %p104_p9 = pnand %p103_p8, %p97_p5 }
  0x17   :  { %107 = shalt.err (!%p104_p9)
}
  0x18   :  { %31 = dma.hbm_to_vmem [thread:$0]  %s170_s1, 32, %s29_s17, [#allocation6]  }
  0x19   :  { %128 = dma.done.wait [#allocation3], 64  }
  0x1a   :  { %129 = vsyncadd [#allocation3], 4294967232 }
  0x1b   :  { %130 = dma.done.wait [#allocation6], 32  }
  0x1c   :  { %131 = vsyncadd [#allocation6], 4294967264  ;;  %s138_s21 = smov [#allocation7]   ;;  %v38_v0 = vld [vmem:[#allocation2] sm:$0x3] }
  0x1d   :  { %s50_s0 = sshll.u32 %s138_s21, 4  ;;  %v40_v1 = vld [vmem:[#allocation5] sm:$0x3]  ;;  %v39_v2 = vld [vmem:[#allocation2 + $0x2] sm:$0x3]  ;;  %s51_s0 = int_to_ptr.vmem [resolvable:$true] %s50_s0 }
  0x1e   :  { %v41_v3 = vadd.f32 %v40_v1, %v38_v0  ;;  %v42_v4 = vadd.f32 %v40_v1, %v39_v2  ;;  %s108_s22 = scalar_lea.vmem %s51_s0, 64  ;;  %p113_p11 = scmp.lt.s32.totalorder %s51_s0, %s51_s0 }
  0x1f   :  { %p109_p10 = scmp.ne.s32.totalorder %s51_s0, %s108_s22  ;;  %p114_p12 = scmp.lt.s32.totalorder %s108_s22, %s108_s22 }
  0x20   :  { %43 = vst [vmem:[#allocation7] sm:$0x3] %v41_v3  ;;  %44 = vst [vmem:[#allocation7 + $0x2] sm:$0x3] %v42_v4 }
  0x21   :  { %p115_p13 = por %p114_p12, %p113_p11 }
  0x23   :  { %p116_p0 = pnand %p115_p13, %p109_p10 }
  0x25   :  { %119 = shalt.err (!%p116_p0)
}
  0x26   :  { %56 = dma.vmem_to_hbm [thread:$0]  %s51_s0, 64, %s171_s2, [#allocation4], %s135_s12, %s135_s12, %s136_s13  }
  0x27   :  { %132 = dma.done.wait [#allocation4], 64  }
  0x28   :  { %133 = vsyncadd [#allocation4], 4294967232 }
  0x29   :  { %60 = vsyncpa [#allocation3], 1 }
  0x2a   :  { %61 = vsyncpa [#allocation6], 1 }
  0x2b   :  { %62 = vsyncpa [#allocation4], 1 }

</bundles_post_ra>
